<compile_context>
chip_gen: v7x
topology: tpu7x:2x2x1
jax: 0.10.0
libtpu: 0.0.40
codegen_flags: <defaults>
</compile_context>

<pallas_src>
import functools

import jax
import jax.numpy as jnp
from jax.experimental import pallas as pl
from jax.experimental.pallas import tpu as pltpu


def _round_up(x: int, m: int) -> int:
    return ((x + m - 1) // m) * m


def _fused_mlp_kernel(*refs, n_layers, actual_dims, apply_act, use_layernorm,
                      matmul_dtype, eps):
    """refs = x_ref, (w_0, b_0), ..., (w_{L-1}, b_{L-1}), [gamma, beta], o_ref."""
    idx = 0
    x_ref = refs[idx]; idx += 1
    wb = []
    for _ in range(n_layers):
        wb.append((refs[idx], refs[idx + 1]))
        idx += 2
    if use_layernorm:
        g_ref = refs[idx]
        be_ref = refs[idx + 1]
        idx += 2
    o_ref = refs[idx]

    h = x_ref[...]                       # stored in matmul_dtype (bf16 fast path)
    for i in range(n_layers):
        w_ref, b_ref = wb[i]
        # MXU matmul; operands in matmul_dtype (weights stored that way), f32 accumulate.
        y = jnp.dot(h.astype(matmul_dtype), w_ref[...],
                    preferred_element_type=jnp.float32)
        y = y + b_ref[...]               # bias is f32
        if apply_act[i]:
            if use_layernorm:
                d_actual = actual_dims[i + 1]      # true (unpadded) feature width
                d_pad = y.shape[-1]
                inv_d = 1.0 / float(d_actual)
                if d_actual == d_pad:
                    # Lane-dense case: plain mean/var, no mask overhead.
                    mean = jnp.sum(y, axis=-1, keepdims=True) * inv_d
                    centered = y - mean
                    var = jnp.sum(centered * centered, axis=-1, keepdims=True) * inv_d
                else:
                    lane = jax.lax.broadcasted_iota(jnp.int32, (1, d_pad), 1)
                    mask = (lane < d_actual).astype(jnp.float32)
                    # Padded lanes of y are exactly zero (zero-padded W, b), so the
                    # plain sum equals the sum over real lanes.
                    mean = jnp.sum(y, axis=-1, keepdims=True) * inv_d
                    centered = (y - mean) * mask
                    var = jnp.sum(centered * centered, axis=-1, keepdims=True) * inv_d
                y = centered * jax.lax.rsqrt(var + eps)
                # gamma/beta are zero-padded, so padded lanes stay exactly zero.
                y = y * g_ref[...] + be_ref[...]
            y = jnp.maximum(y, 0.0)      # ReLU
            # TODO(synk): dropout (train mode) would go here; eval mode = identity.
        h = y
    o_ref[...] = h.astype(o_ref.dtype)


def prepare_mlp_params(params, gamma, beta, *, use_layernorm,
                       matmul_dtype=jnp.bfloat16):
    """Pad params once (call at init / after each param update), not per forward.

    params: list of (w_t, b) with w_t of shape (in, out).  Weights are stored in
    matmul_dtype (bf16 by default); bias / LayerNorm params stay f32.
    """
    n_layers = len(params)
    dims = [int(params[0][0].shape[0])] + [int(w.shape[1]) for w, _ in params]
    pdims = [_round_up(d, 128) for d in dims]

    padded = []
    for li, (w_t, b) in enumerate(params):
        wp = jnp.zeros((pdims[li], pdims[li + 1]), matmul_dtype)
        wp = wp.at[:dims[li], :dims[li + 1]].set(w_t.astype(matmul_dtype))
        bp = jnp.zeros((1, pdims[li + 1]), jnp.float32)
        bp = bp.at[0, :dims[li + 1]].set(b.astype(jnp.float32))
        padded += [wp, bp]

    ln_dim = int(gamma.shape[0])
    hid_pad = _round_up(ln_dim, 128)
    if use_layernorm:
        gp = jnp.zeros((1, hid_pad), jnp.float32).at[0, :ln_dim].set(gamma)
        bep = jnp.zeros((1, hid_pad), jnp.float32).at[0, :ln_dim].set(beta)
        padded += [gp, bep]

    return dict(padded=tuple(padded), dims=tuple(dims), pdims=tuple(pdims),
                hid_pad=hid_pad, ln_dim=ln_dim, n_layers=n_layers,
                use_layernorm=bool(use_layernorm), matmul_dtype=matmul_dtype)


def mlp_forward(x, prepared, *, activate_final, tb=None, eps=1e-5):
    """Fused Pallas forward. x: (B, input_dim); prepared: from prepare_mlp_params."""
    dims = prepared["dims"]
    pdims = prepared["pdims"]
    n_layers = prepared["n_layers"]
    use_layernorm = prepared["use_layernorm"]
    matmul_dtype = prepared["matmul_dtype"]
    hid_pad = prepared["hid_pad"]

    B, input_dim = x.shape
    if input_dim != dims[0]:
        raise ValueError(f"x feature dim {input_dim} != expected {dims[0]}")
    apply_act = tuple((i != n_layers - 1) or bool(activate_final)
                      for i in range(n_layers))
    if use_layernorm and activate_final and dims[-1] != prepared["ln_dim"]:
        # PyTorch's nn.LayerNorm(hidden_sizes) would raise on a mismatched final dim.
        raise ValueError("LayerNorm size must match final layer dim when activate_final")

    itemsize = jnp.dtype(matmul_dtype).itemsize
    # Resident (single-buffered) params + per-tile working-set estimates (bytes).
    resident_bytes = (sum(pdims[i] * pdims[i + 1] for i in range(n_layers)) * itemsize
                      + sum(pdims[1:]) * 4
                      + (2 * hid_pad * 4 if use_layernorm else 0))

    def _per_tile_bytes(t):
        return (2 * t * (pdims[0] * itemsize + pdims[-1] * 4)   # x / out double-buffered
                + t * max(pdims) * (2 * 4 + itemsize))          # f32 act (x2) + matmul copy

    # --- batch tiling ------------------------------------------------------
    if tb is None:
        tb = min(512, _round_up(B, 8))
        # v7x: split across the grid only when each tile keeps >=128 rows
        # (2 TensorCores via "parallel"); v5e/v6e are single-TC -> one big tile.
        if B >= 256:
            tb = min(tb, _round_up(-(-B // 2), 128))
        # Shrink tb if the per-tile working set would blow the VMEM budget
        # (48 MiB keeps headroom on v7x's 64 MiB physical VMEM).
        budget = 48 << 20
        while tb > 8 and resident_bytes + _per_tile_bytes(tb) > budget:
            tb = max(8, (tb // 2 // 8) * 8)
    B_pad = _round_up(max(B, tb), tb)
    n_tiles = B_pad // tb

    vmem_limit_bytes = int(min(max(int((resident_bytes + _per_tile_bytes(tb)) * 1.3),
                                   4 << 20), 64 << 20))

    # --- per-call padding: only x (params were padded once in prepare) -----
    x_p = jnp.zeros((B_pad, pdims[0]), matmul_dtype)
    x_p = x_p.at[:B, :input_dim].set(x.astype(matmul_dtype))

    # --- BlockSpecs: x/out tiled over batch; params resident, single-buffered ---
    in_specs = [pl.BlockSpec((tb, pdims[0]), lambda i: (i, 0))]
    for li in range(n_layers):
        in_specs.append(pl.BlockSpec((pdims[li], pdims[li + 1]), lambda i: (0, 0),
                                     pipeline_mode=pl.Buffered(1)))
        in_specs.append(pl.BlockSpec((1, pdims[li + 1]), lambda i: (0, 0),
                                     pipeline_mode=pl.Buffered(1)))
    if use_layernorm:
        in_specs.append(pl.BlockSpec((1, hid_pad), lambda i: (0, 0),
                                     pipeline_mode=pl.Buffered(1)))
        in_specs.append(pl.BlockSpec((1, hid_pad), lambda i: (0, 0),
                                     pipeline_mode=pl.Buffered(1)))
    out_spec = pl.BlockSpec((tb, pdims[-1]), lambda i: (i, 0))

    kernel = functools.partial(
        _fused_mlp_kernel,
        n_layers=n_layers,
        actual_dims=tuple(dims),
        apply_act=apply_act,
        use_layernorm=use_layernorm,
        matmul_dtype=matmul_dtype,
        eps=eps,
    )

    flops = 2 * B_pad * sum(pdims[i] * pdims[i + 1] for i in range(n_layers))
    n_ln = sum(apply_act) if use_layernorm else 0
    bytes_accessed = (itemsize * (B_pad * pdims[0]
                                  + sum(pdims[i] * pdims[i + 1] for i in range(n_layers)))
                      + 4 * (B_pad * pdims[-1] + sum(pdims[1:])
                             + (2 * hid_pad if use_layernorm else 0)))

    out_full = pl.pallas_call(
        kernel,
        out_shape=jax.ShapeDtypeStruct((B_pad, pdims[-1]), jnp.float32),
        grid_spec=pltpu.PrefetchScalarGridSpec(
            num_scalar_prefetch=0,
            grid=(n_tiles,),
            in_specs=in_specs,
            out_specs=out_spec,
        ),
        compiler_params=pltpu.CompilerParams(
            dimension_semantics=("parallel",),
            vmem_limit_bytes=vmem_limit_bytes),
        cost_estimate=pl.CostEstimate(
            flops=flops,
            transcendentals=B_pad * n_ln,
            bytes_accessed=bytes_accessed),
    )(x_p, *prepared["padded"])

    return out_full[:B, :dims[-1]]


def init_mlp_params(key, input_dim, output_dim, hidden_sizes, n_layers):
    """Deterministic init matching PyTorch Linear shapes; weights stored as (in, out)."""
    assert n_layers >= 2
    dims = [input_dim] + [hidden_sizes] * (n_layers - 1) + [output_dim]
    params = []
    for i in range(n_layers):
        fan_in, fan_out = dims[i], dims[i + 1]
        key, kw, kb = jax.random.split(key, 3)
        bound = 1.0 / float(jnp.sqrt(fan_in))
        w_t = jax.random.uniform(kw, (fan_in, fan_out), jnp.float32, -bound, bound)
        b = jax.random.uniform(kb, (fan_out,), jnp.float32, -bound, bound)
        params.append((w_t, b))
    gamma = jnp.ones((hidden_sizes,), jnp.float32)   # nn.LayerNorm default affine
    beta = jnp.zeros((hidden_sizes,), jnp.float32)
    return params, gamma, beta


def mlp_reference(x, params, gamma, beta, *, use_layernorm, activate_final, eps=1e-5):
    """Pure-JAX reference mirroring MLPNetwork.forward (eval mode)."""
    n = len(params)
    h = x
    for i, (w_t, b) in enumerate(params):
        h = h @ w_t + b
        if i != n - 1 or activate_final:
            if use_layernorm:
                mean = jnp.mean(h, axis=-1, keepdims=True)
                var = jnp.mean(jnp.square(h - mean), axis=-1, keepdims=True)
                h = (h - mean) * jax.lax.rsqrt(var + eps) * gamma + beta
            h = jnp.maximum(h, 0.0)
    return h


if __name__ == "__main__":
    batch = 64
    input_dim = 16
    hidden_sizes = 32
    output_dim = 4
    n_layers = 3
    use_layernorm = True
    activate_final = False

    key = jax.random.PRNGKey(0)
    kx, kp = jax.random.split(key)
    x = jax.random.normal(kx, (batch, input_dim), jnp.float32)
    params, gamma, beta = init_mlp_params(kp, input_dim, output_dim,
                                          hidden_sizes, n_layers)
    ref = mlp_reference(x, params, gamma, beta,
                        use_layernorm=use_layernorm, activate_final=activate_final)

    # f32 matmul path — tight check vs reference.
    prep_f32 = prepare_mlp_params(params, gamma, beta,
                                  use_layernorm=use_layernorm,
                                  matmul_dtype=jnp.float32)
    out = mlp_forward(x, prep_f32, activate_final=activate_final)
    out = jax.block_until_ready(out)
    assert out.shape == (batch, output_dim)
    assert jnp.allclose(out, ref, atol=2e-5, rtol=2e-5), "Pallas f32 output mismatch"

    # bf16 matmul path (default; native MXU rate) — loose check.
    prep_bf16 = prepare_mlp_params(params, gamma, beta,
                                   use_layernorm=use_layernorm)   # bf16 default
    out_bf16 = mlp_forward(x, prep_bf16, activate_final=activate_final)
    out_bf16 = jax.block_until_ready(out_bf16)
    assert out_bf16.shape == (batch, output_dim)
    assert bool(jnp.all(jnp.isfinite(out_bf16)))
    assert float(jnp.max(jnp.abs(out_bf16 - ref))) < 0.25, "Pallas bf16 output mismatch"

    # No-LayerNorm config (exercises the gamma/beta-free spec path).
    prep_noln = prepare_mlp_params(params, gamma, beta,
                                   use_layernorm=False, matmul_dtype=jnp.float32)
    out_noln = mlp_forward(x, prep_noln, activate_final=False)
    out_noln = jax.block_until_ready(out_noln)
    ref_noln = mlp_reference(x, params, gamma, beta,
                             use_layernorm=False, activate_final=False)
    assert jnp.allclose(out_noln, ref_noln, atol=2e-5, rtol=2e-5), \
        "Pallas no-LN output mismatch"

    print("KERNEL_OK")
</pallas_src>

<mosaic_0001>
module attributes {stable_mosaic.version = 11 : i64} {
  func.func @_fused_mlp_kernel(%arg0: i32, %arg1: memref<64x128xf32, #tpu.memory_space<vmem>>, %arg2: memref<128x128xf32, #tpu.memory_space<vmem>>, %arg3: memref<1x128xf32, #tpu.memory_space<vmem>>, %arg4: memref<128x128xf32, #tpu.memory_space<vmem>>, %arg5: memref<1x128xf32, #tpu.memory_space<vmem>>, %arg6: memref<128x128xf32, #tpu.memory_space<vmem>>, %arg7: memref<1x128xf32, #tpu.memory_space<vmem>>, %arg8: memref<1x128xf32, #tpu.memory_space<vmem>>, %arg9: memref<1x128xf32, #tpu.memory_space<vmem>>, %arg10: memref<64x128xf32, #tpu.memory_space<vmem>>) attributes {dimension_semantics = [#tpu.dimension_semantics<parallel>], iteration_bounds = array<i64: 1>, scalar_prefetch = 0 : i64, scratch_operands = 0 : i64, tpu.core_type = #tpu.core_type<tc>, window_params = [{transform_indices = @transform_0, window_bounds = array<i64: 64, 128>}, {pipeline_mode = #tpu.pipeline_mode<synchronous>, transform_indices = @transform_1, window_bounds = array<i64: 128, 128>}, {pipeline_mode = #tpu.pipeline_mode<synchronous>, transform_indices = @transform_2, window_bounds = array<i64: 1, 128>}, {pipeline_mode = #tpu.pipeline_mode<synchronous>, transform_indices = @transform_3, window_bounds = array<i64: 128, 128>}, {pipeline_mode = #tpu.pipeline_mode<synchronous>, transform_indices = @transform_4, window_bounds = array<i64: 1, 128>}, {pipeline_mode = #tpu.pipeline_mode<synchronous>, transform_indices = @transform_5, window_bounds = array<i64: 128, 128>}, {pipeline_mode = #tpu.pipeline_mode<synchronous>, transform_indices = @transform_6, window_bounds = array<i64: 1, 128>}, {pipeline_mode = #tpu.pipeline_mode<synchronous>, transform_indices = @transform_7, window_bounds = array<i64: 1, 128>}, {pipeline_mode = #tpu.pipeline_mode<synchronous>, transform_indices = @transform_8, window_bounds = array<i64: 1, 128>}, {transform_indices = @transform_9, window_bounds = array<i64: 64, 128>}]} {
    %c0 = arith.constant 0 : index
    %c0_0 = arith.constant 0 : index
    %0 = vector.load %arg1[%c0, %c0_0] : memref<64x128xf32, #tpu.memory_space<vmem>>, vector<64x128xf32>
    %c0_1 = arith.constant 0 : index
    %c0_2 = arith.constant 0 : index
    %1 = vector.load %arg2[%c0_1, %c0_2] : memref<128x128xf32, #tpu.memory_space<vmem>>, vector<128x128xf32>
    %cst = arith.constant dense<0.000000e+00> : vector<64x128xf32>
    %2 = tpu.matmul %0, %1, %cst {dimension_numbers = #tpu.dot_dimension_numbers<[1], [0], [0], [1], [0, 0, 1, 1], [], []>} : vector<64x128xf32>, vector<128x128xf32>, vector<64x128xf32> -> vector<64x128xf32>
    %c0_3 = arith.constant 0 : index
    %c0_4 = arith.constant 0 : index
    %3 = vector.load %arg3[%c0_3, %c0_4] : memref<1x128xf32, #tpu.memory_space<vmem>>, vector<1x128xf32>
    %4 = vector.broadcast %3 : vector<1x128xf32> to vector<64x128xf32>
    %5 = arith.addf %2, %4 : vector<64x128xf32>
    %6 = tpu.iota {dimensions = array<i32: 1>} : vector<1x128xi32>
    %c32_i32 = arith.constant 32 : i32
    %7 = vector.broadcast %c32_i32 : i32 to vector<1x128xi32>
    %8 = arith.cmpi slt, %6, %7 : vector<1x128xi32>
    %9 = arith.extui %8 : vector<1x128xi1> to vector<1x128xi32>
    %10 = arith.sitofp %9 : vector<1x128xi32> to vector<1x128xf32>
    %cst_5 = arith.constant dense<0.000000e+00> : vector<64xf32>
    %11 = vector.multi_reduction <add>, %5, %cst_5 [1] : vector<64x128xf32> to vector<64xf32>
    %12 = vector.shape_cast %11 : vector<64xf32> to vector<64x1xf32>
    %cst_6 = arith.constant 3.125000e-02 : f32
    %13 = vector.broadcast %cst_6 : f32 to vector<64x1xf32>
    %14 = arith.mulf %12, %13 : vector<64x1xf32>
    %15 = vector.broadcast %14 : vector<64x1xf32> to vector<64x128xf32>
    %16 = arith.subf %5, %15 : vector<64x128xf32>
    %17 = vector.broadcast %10 : vector<1x128xf32> to vector<64x128xf32>
    %18 = arith.mulf %16, %17 : vector<64x128xf32>
    %19 = arith.mulf %18, %18 : vector<64x128xf32>
    %cst_7 = arith.constant dense<0.000000e+00> : vector<64xf32>
    %20 = vector.multi_reduction <add>, %19, %cst_7 [1] : vector<64x128xf32> to vector<64xf32>
    %21 = vector.shape_cast %20 : vector<64xf32> to vector<64x1xf32>
    %cst_8 = arith.constant 3.125000e-02 : f32
    %22 = vector.broadcast %cst_8 : f32 to vector<64x1xf32>
    %23 = arith.mulf %21, %22 : vector<64x1xf32>
    %cst_9 = arith.constant 9.99999974E-6 : f32
    %24 = vector.broadcast %cst_9 : f32 to vector<64x1xf32>
    %25 = arith.addf %23, %24 : vector<64x1xf32>
    %26 = math.rsqrt %25 : vector<64x1xf32>
    %27 = vector.broadcast %26 : vector<64x1xf32> to vector<64x128xf32>
    %28 = arith.mulf %18, %27 : vector<64x128xf32>
    %c0_10 = arith.constant 0 : index
    %c0_11 = arith.constant 0 : index
    %29 = vector.load %arg8[%c0_10, %c0_11] : memref<1x128xf32, #tpu.memory_space<vmem>>, vector<1x128xf32>
    %30 = vector.broadcast %29 : vector<1x128xf32> to vector<64x128xf32>
    %31 = arith.mulf %28, %30 : vector<64x128xf32>
    %c0_12 = arith.constant 0 : index
    %c0_13 = arith.constant 0 : index
    %32 = vector.load %arg9[%c0_12, %c0_13] : memref<1x128xf32, #tpu.memory_space<vmem>>, vector<1x128xf32>
    %33 = vector.broadcast %32 : vector<1x128xf32> to vector<64x128xf32>
    %34 = arith.addf %31, %33 : vector<64x128xf32>
    %cst_14 = arith.constant 0.000000e+00 : f32
    %35 = vector.broadcast %cst_14 : f32 to vector<64x128xf32>
    %36 = arith.maximumf %34, %35 : vector<64x128xf32>
    %c0_15 = arith.constant 0 : index
    %c0_16 = arith.constant 0 : index
    %37 = vector.load %arg4[%c0_15, %c0_16] : memref<128x128xf32, #tpu.memory_space<vmem>>, vector<128x128xf32>
    %cst_17 = arith.constant dense<0.000000e+00> : vector<64x128xf32>
    %38 = tpu.matmul %36, %37, %cst_17 {dimension_numbers = #tpu.dot_dimension_numbers<[1], [0], [0], [1], [0, 0, 1, 1], [], []>} : vector<64x128xf32>, vector<128x128xf32>, vector<64x128xf32> -> vector<64x128xf32>
    %c0_18 = arith.constant 0 : index
    %c0_19 = arith.constant 0 : index
    %39 = vector.load %arg5[%c0_18, %c0_19] : memref<1x128xf32, #tpu.memory_space<vmem>>, vector<1x128xf32>
    %40 = vector.broadcast %39 : vector<1x128xf32> to vector<64x128xf32>
    %41 = arith.addf %38, %40 : vector<64x128xf32>
    %42 = tpu.iota {dimensions = array<i32: 1>} : vector<1x128xi32>
    %c32_i32_20 = arith.constant 32 : i32
    %43 = vector.broadcast %c32_i32_20 : i32 to vector<1x128xi32>
    %44 = arith.cmpi slt, %42, %43 : vector<1x128xi32>
    %45 = arith.extui %44 : vector<1x128xi1> to vector<1x128xi32>
    %46 = arith.sitofp %45 : vector<1x128xi32> to vector<1x128xf32>
    %cst_21 = arith.constant dense<0.000000e+00> : vector<64xf32>
    %47 = vector.multi_reduction <add>, %41, %cst_21 [1] : vector<64x128xf32> to vector<64xf32>
    %48 = vector.shape_cast %47 : vector<64xf32> to vector<64x1xf32>
    %cst_22 = arith.constant 3.125000e-02 : f32
    %49 = vector.broadcast %cst_22 : f32 to vector<64x1xf32>
    %50 = arith.mulf %48, %49 : vector<64x1xf32>
    %51 = vector.broadcast %50 : vector<64x1xf32> to vector<64x128xf32>
    %52 = arith.subf %41, %51 : vector<64x128xf32>
    %53 = vector.broadcast %46 : vector<1x128xf32> to vector<64x128xf32>
    %54 = arith.mulf %52, %53 : vector<64x128xf32>
    %55 = arith.mulf %54, %54 : vector<64x128xf32>
    %cst_23 = arith.constant dense<0.000000e+00> : vector<64xf32>
    %56 = vector.multi_reduction <add>, %55, %cst_23 [1] : vector<64x128xf32> to vector<64xf32>
    %57 = vector.shape_cast %56 : vector<64xf32> to vector<64x1xf32>
    %cst_24 = arith.constant 3.125000e-02 : f32
    %58 = vector.broadcast %cst_24 : f32 to vector<64x1xf32>
    %59 = arith.mulf %57, %58 : vector<64x1xf32>
    %cst_25 = arith.constant 9.99999974E-6 : f32
    %60 = vector.broadcast %cst_25 : f32 to vector<64x1xf32>
    %61 = arith.addf %59, %60 : vector<64x1xf32>
    %62 = math.rsqrt %61 : vector<64x1xf32>
    %63 = vector.broadcast %62 : vector<64x1xf32> to vector<64x128xf32>
    %64 = arith.mulf %54, %63 : vector<64x128xf32>
    %c0_26 = arith.constant 0 : index
    %c0_27 = arith.constant 0 : index
    %65 = vector.load %arg8[%c0_26, %c0_27] : memref<1x128xf32, #tpu.memory_space<vmem>>, vector<1x128xf32>
    %66 = vector.broadcast %65 : vector<1x128xf32> to vector<64x128xf32>
    %67 = arith.mulf %64, %66 : vector<64x128xf32>
    %c0_28 = arith.constant 0 : index
    %c0_29 = arith.constant 0 : index
    %68 = vector.load %arg9[%c0_28, %c0_29] : memref<1x128xf32, #tpu.memory_space<vmem>>, vector<1x128xf32>
    %69 = vector.broadcast %68 : vector<1x128xf32> to vector<64x128xf32>
    %70 = arith.addf %67, %69 : vector<64x128xf32>
    %cst_30 = arith.constant 0.000000e+00 : f32
    %71 = vector.broadcast %cst_30 : f32 to vector<64x128xf32>
    %72 = arith.maximumf %70, %71 : vector<64x128xf32>
    %c0_31 = arith.constant 0 : index
    %c0_32 = arith.constant 0 : index
    %73 = vector.load %arg6[%c0_31, %c0_32] : memref<128x128xf32, #tpu.memory_space<vmem>>, vector<128x128xf32>
    %cst_33 = arith.constant dense<0.000000e+00> : vector<64x128xf32>
    %74 = tpu.matmul %72, %73, %cst_33 {dimension_numbers = #tpu.dot_dimension_numbers<[1], [0], [0], [1], [0, 0, 1, 1], [], []>} : vector<64x128xf32>, vector<128x128xf32>, vector<64x128xf32> -> vector<64x128xf32>
    %c0_34 = arith.constant 0 : index
    %c0_35 = arith.constant 0 : index
    %75 = vector.load %arg7[%c0_34, %c0_35] : memref<1x128xf32, #tpu.memory_space<vmem>>, vector<1x128xf32>
    %76 = vector.broadcast %75 : vector<1x128xf32> to vector<64x128xf32>
    %77 = arith.addf %74, %76 : vector<64x128xf32>
    %c0_36 = arith.constant 0 : index
    %c0_37 = arith.constant 0 : index
    %78 = vector.load %arg10[%c0_36, %c0_37] : memref<64x128xf32, #tpu.memory_space<vmem>>, vector<64x128xf32>
    tpu.vector_store %arg10[%c0_36, %c0_37], %77 {strides = array<i32>} : memref<64x128xf32, #tpu.memory_space<vmem>>, vector<64x128xf32>,
    return
  }
  func.func @transform_0(%arg0: i32) -> (i32, i32) {
    %c0_i32 = arith.constant 0 : i32
    %c0_i32_0 = arith.constant 0 : i32
    return %arg0, %c0_i32 : i32, i32
  }
  func.func @transform_1(%arg0: i32) -> (i32, i32) {
    %c0_i32 = arith.constant 0 : i32
    %c0_i32_0 = arith.constant 0 : i32
    %c0_i32_1 = arith.constant 0 : i32
    return %c0_i32, %c0_i32_0 : i32, i32
  }
  func.func @transform_2(%arg0: i32) -> (i32, i32) {
    %c0_i32 = arith.constant 0 : i32
    %c0_i32_0 = arith.constant 0 : i32
    %c0_i32_1 = arith.constant 0 : i32
    return %c0_i32, %c0_i32_0 : i32, i32
  }
  func.func @transform_3(%arg0: i32) -> (i32, i32) {
    %c0_i32 = arith.constant 0 : i32
    %c0_i32_0 = arith.constant 0 : i32
    %c0_i32_1 = arith.constant 0 : i32
    return %c0_i32, %c0_i32_0 : i32, i32
  }
  func.func @transform_4(%arg0: i32) -> (i32, i32) {
    %c0_i32 = arith.constant 0 : i32
    %c0_i32_0 = arith.constant 0 : i32
    %c0_i32_1 = arith.constant 0 : i32
    return %c0_i32, %c0_i32_0 : i32, i32
  }
  func.func @transform_5(%arg0: i32) -> (i32, i32) {
    %c0_i32 = arith.constant 0 : i32
    %c0_i32_0 = arith.constant 0 : i32
    %c0_i32_1 = arith.constant 0 : i32
    return %c0_i32, %c0_i32_0 : i32, i32
  }
  func.func @transform_6(%arg0: i32) -> (i32, i32) {
    %c0_i32 = arith.constant 0 : i32
    %c0_i32_0 = arith.constant 0 : i32
    %c0_i32_1 = arith.constant 0 : i32
    return %c0_i32, %c0_i32_0 : i32, i32
  }
  func.func @transform_7(%arg0: i32) -> (i32, i32) {
    %c0_i32 = arith.constant 0 : i32
    %c0_i32_0 = arith.constant 0 : i32
    %c0_i32_1 = arith.constant 0 : i32
    return %c0_i32, %c0_i32_0 : i32, i32
  }
  func.func @transform_8(%arg0: i32) -> (i32, i32) {
    %c0_i32 = arith.constant 0 : i32
    %c0_i32_0 = arith.constant 0 : i32
    %c0_i32_1 = arith.constant 0 : i32
    return %c0_i32, %c0_i32_0 : i32, i32
  }
  func.func @transform_9(%arg0: i32) -> (i32, i32) {
    %c0_i32 = arith.constant 0 : i32
    %c0_i32_0 = arith.constant 0 : i32
    return %arg0, %c0_i32 : i32, i32
  }
}

</mosaic_0001>

<bundles_post_ra>
// kernel: tpu_custom_call.1
= control target key start
LH: loop header
LB: loop body
LE: loop exit
PB: predicated region body
PF: predicated region fallthrough
CT: control target
= control target key end

     0   :  { %14 = vsyncpa [#allocation3], 0  ;;  %s1546_s0 = inlined_call_operand.hbm [shape: f32[64,128], index: 0, kind: input, shape index: {}]   ;;  %s1547_s1 = inlined_call_operand.hbm [shape: f32[128,128], index: 1, kind: input, shape index: {}]   ;;  %s1548_s2 = inlined_call_operand.vmem [shape: f32[1,128], index: 2, kind: input, shape index: {}]   ;;  %s1549_s3 = inlined_call_operand.hbm [shape: f32[128,128], index: 3, kind: input, shape index: {}]   ;;  %s1550_s4 = inlined_call_operand.vmem [shape: f32[1,128], index: 4, kind: input, shape index: {}]   ;;  %s1551_s5 = inlined_call_operand.hbm [shape: f32[128,128], index: 5, kind: input, shape index: {}]   ;;  %s1552_s6 = inlined_call_operand.vmem [shape: f32[1,128], index: 6, kind: input, shape index: {}]   ;;  %s1553_s7 = inlined_call_operand.vmem [shape: f32[1,128], index: 7, kind: input, shape index: {}]   ;;  %s1554_s8 = inlined_call_operand.vmem [shape: f32[1,128], index: 8, kind: input, shape index: {}]   ;;  %s1555_s9 = inlined_call_operand.hbm [shape: f32[64,128], index: 9, kind: output, shape index: {}]  }
   0x1   :  { %15 = vsyncpa [#allocation6], 0 }
   0x2   :  { %16 = vsyncpa [#allocation9], 0 }
   0x3   :  { %17 = vsyncpa [#allocation4], 0  ;;  %s1246_s30 = smov [#allocation5]   ;;  %s1247_s11 = smov [#allocation2]  }
   0x4   :  { %s35_s10 = sshll.u32 %s1246_s30, 4  ;;  %s23_s12 = sshll.u32 %s1247_s11, 4  ;;  %s36_s10 = int_to_ptr.vmem [resolvable:$true] %s35_s10  ;;  %s1304_s12 = int_to_ptr.vmem [resolvable:$true] %s23_s12 }
   0x5   :  { %s1128_s15 = scalar_lea.hbm %s1547_s1, 2048 }
   0x6   :  { %p1129_p0 = scmp.ne.s32.totalorder %s1547_s1, %s1128_s15  ;;  %p1132_p1 = scmp.lt.u32.totalorder %s1128_s15, %s1547_s1 }
   0x8   :  { %p1134_p2 = pnand %p1132_p1, %p1129_p0 }
   0xa   :  { %1137 = shalt.err (!%p1134_p2)
}
   0xb   :  { %s1138_s20 = scalar_lea.vmem %s36_s10, 2048  ;;  %p1143_p4 = scmp.lt.s32.totalorder %s36_s10, %s36_s10 }
   0xc   :  { %p1139_p3 = scmp.ne.s32.totalorder %s36_s10, %s1138_s20  ;;  %p1144_p5 = scmp.lt.s32.totalorder %s1138_s20, %s1138_s20 }
   0xe   :  { %p1145_p6 = por %p1144_p5, %p1143_p4 }
  0x10   :  { %p1146_p7 = pnand %p1145_p6, %p1139_p3 }
  0x12   :  { %1149 = shalt.err (!%p1146_p7)
}
  0x13   :  { %s1248_s21 = smov 128   ;;  %s1249_s22 = smov 8  }
  0x14   :  { %41 = dma.hbm_to_vmem [thread:$0]  %s1547_s1, 2048, %s36_s10, [#allocation6], %s1248_s21, %s1248_s21, %s1249_s22  }
  0x15   :  { %s1150_s27 = scalar_lea.hbm %s1546_s0, 1024 }
  0x16   :  { %p1151_p8 = scmp.ne.s32.totalorder %s1546_s0, %s1150_s27  ;;  %p1154_p9 = scmp.lt.u32.totalorder %s1150_s27, %s1546_s0 }
  0x18   :  { %p1156_p10 = pnand %p1154_p9, %p1151_p8 }
  0x1a   :  { %1159 = shalt.err (!%p1156_p10)
}
  0x1b   :  { %s1160_s13 = scalar_lea.vmem %s1304_s12, 1024  ;;  %p1165_p12 = scmp.lt.s32.totalorder %s1304_s12, %s1304_s12 }
  0x1c   :  { %p1161_p11 = scmp.ne.s32.totalorder %s1304_s12, %s1160_s13  ;;  %p1166_p13 = scmp.lt.s32.totalorder %s1160_s13, %s1160_s13 }
  0x1e   :  { %p1167_p0 = por %p1166_p13, %p1165_p12 }
  0x20   :  { %p1168_p1 = pnand %p1167_p0, %p1161_p11 }
  0x22   :  { %1171 = shalt.err (!%p1168_p1)
}
  0x23   :  { %29 = dma.hbm_to_vmem [thread:$0]  %s1546_s0, 1024, %s1304_s12, [#allocation3], %s1248_s21, %s1248_s21, %s1249_s22  }
  0x24   :  { %s1250_s14 = smov [#allocation7]   ;;  %s1251_s16 = smov [#allocation8]  }
  0x25   :  { %s49_s15 = sshll.u32 %s1250_s14, 4  ;;  %s63_s17 = sshll.u32 %s1251_s16, 4  ;;  %s50_s15 = int_to_ptr.vmem [resolvable:$true] %s49_s15  ;;  %s1341_s17 = int_to_ptr.vmem [resolvable:$true] %s63_s17 }
  0x26   :  { %s1172_s20 = scalar_lea.hbm %s1549_s3, 2048 }
  0x27   :  { %p1173_p2 = scmp.ne.s32.totalorder %s1549_s3, %s1172_s20  ;;  %p1176_p3 = scmp.lt.u32.totalorder %s1172_s20, %s1549_s3 }
  0x29   :  { %p1178_p4 = pnand %p1176_p3, %p1173_p2 }
  0x2b   :  { %1181 = shalt.err (!%p1178_p4)
}
  0x2c   :  { %s1182_s0 = scalar_lea.vmem %s50_s15, 2048  ;;  %p1187_p6 = scmp.lt.s32.totalorder %s50_s15, %s50_s15 }
  0x2d   :  { %p1183_p5 = scmp.ne.s32.totalorder %s50_s15, %s1182_s0  ;;  %p1188_p7 = scmp.lt.s32.totalorder %s1182_s0, %s1182_s0 }
  0x2f   :  { %p1189_p8 = por %p1188_p7, %p1187_p6 }
  0x31   :  { %p1190_p9 = pnand %p1189_p8, %p1183_p5 }
  0x33   :  { %1193 = shalt.err (!%p1190_p9)
}
  0x34   :  { %55 = dma.hbm_to_vmem [thread:$0]  %s1549_s3, 2048, %s50_s15, [#allocation6], %s1248_s21, %s1248_s21, %s1249_s22  }
  0x35   :  { %s1194_s30 = scalar_lea.hbm %s1551_s5, 2048 }
  0x36   :  { %p1195_p10 = scmp.ne.s32.totalorder %s1551_s5, %s1194_s30  ;;  %p1198_p11 = scmp.lt.u32.totalorder %s1194_s30, %s1551_s5 }
  0x38   :  { %p1200_p12 = pnand %p1198_p11, %p1195_p10 }
  0x3a   :  { %1203 = shalt.err (!%p1200_p12)
}
  0x3b   :  { %s1204_s14 = scalar_lea.vmem %s1341_s17, 2048  ;;  %p1209_p0 = scmp.lt.s32.totalorder %s1341_s17, %s1341_s17 }
  0x3c   :  { %p1205_p13 = scmp.ne.s32.totalorder %s1341_s17, %s1204_s14  ;;  %p1210_p1 = scmp.lt.s32.totalorder %s1204_s14, %s1204_s14 }
  0x3e   :  { %p1211_p2 = por %p1210_p1, %p1209_p0 }
  0x40   :  { %p1212_p3 = pnand %p1211_p2, %p1205_p13 }
  0x42   :  { %1215 = shalt.err (!%p1212_p3)
}
  0x43   :  { %69 = dma.hbm_to_vmem [thread:$0]  %s1551_s5, 2048, %s1341_s17, [#allocation9], %s1248_s21, %s1248_s21, %s1249_s22  }
  0x44   :  { %1238 = dma.done.wait [#allocation3], 1024  }
  0x45   :  { %1239 = vsyncadd [#allocation3], 4294966272 }
  0x46   :  { %1240 = dma.done.wait [#allocation6], 4096  }
  0x47   :  { %1241 = vsyncadd [#allocation6], 4294963200 }
  0x48   :  { %1242 = dma.done.wait [#allocation9], 2048  }
  0x49   :  { %1243 = vsyncadd [#allocation9], 4294965248  ;;  %v96_v0 = vld [vmem:[#allocation5] sm:$0xff]  ;;  %v97_v1 = vld [vmem:[#allocation5 + $0x8] sm:$0xff]  ;;  %v224_v55 = vlaneseq  ;;  %v1252_v59 = vmov 0.0   ;;  %s1253_s23 = smov [#allocation10]  }
  0x4a   :  { %v98_v2 = vld [vmem:[#allocation5 + $0x10] sm:$0xff]  ;;  %v976_v3 = vpack.c.bf16 %v97_v1, %v96_v0  ;;  %v99_v4 = vld [vmem:[#allocation5 + $0x18] sm:$0xff]  ;;  %v100_v6 = vld [vmem:[#allocation5 + $0x20] sm:$0xff] }
  0x4b   :  { %v980_v5 = vpack.c.bf16 %v99_v4, %v98_v2  ;;  %v101_v7 = vld [vmem:[#allocation5 + $0x28] sm:$0xff]  ;;  %v88_v9 = vld [vmem:[#allocation2] sm:$0xff]  ;;  %v102_v10 = vld [vmem:[#allocation5 + $0x30] sm:$0xff]  ;;  %v225_v56 = vand.u32 127, %v224_v55 }
  0x4c   :  { %977 = vmatprep.subr.bf16.mxu0 %v976_v3  ;;  %v984_v8 = vpack.c.bf16 %v101_v7, %v100_v6  ;;  %v103_v11 = vld [vmem:[#allocation5 + $0x38] sm:$0xff]  ;;  %876 = vmatprep.mubr.f32.mxu0 %v88_v9  ;;  %v104_v13 = vld [vmem:[#allocation5 + $0x40] sm:$0xff]  ;;  %v105_v14 = vld [vmem:[#allocation5 + $0x48] sm:$0xff] }
  0x4d   :  { %979 = vmatpush3.bf16.msra.mxu0 %v976_v3  ;;  %v988_v12 = vpack.c.bf16 %v103_v11, %v102_v10  ;;  %v992_v15 = vpack.c.bf16 %v105_v14, %v104_v13  ;;  %v106_v16 = vld [vmem:[#allocation5 + $0x50] sm:$0xff]  ;;  %v107_v17 = vld [vmem:[#allocation5 + $0x58] sm:$0xff]  ;;  %v108_v19 = vld [vmem:[#allocation5 + $0x60] sm:$0xff]  ;;  %vm226_vm0 = vcmp.lt.s32.totalorder %v225_v56, 32 }
  0x4e   :  { %981 = vmatprep.subr.bf16.mxu0 %v980_v5  ;;  %v996_v18 = vpack.c.bf16 %v107_v17, %v106_v16  ;;  %v109_v20 = vld [vmem:[#allocation5 + $0x68] sm:$0xff]  ;;  %v110_v22 = vld [vmem:[#allocation5 + $0x70] sm:$0xff]  ;;  %v111_v23 = vld [vmem:[#allocation5 + $0x78] sm:$0xff]  ;;  %v1384_v60 = vsel %vm226_vm0, 1.0, %v1252_v59 }
  0x4f   :  { %v1000_v21 = vpack.c.bf16 %v109_v20, %v108_v19  ;;  %v1004_v24 = vpack.c.bf16 %v111_v23, %v110_v22  ;;  %v89_v25 = vld [vmem:[#allocation2 + $0x8] sm:$0xff]  ;;  %v90_v26 = vld [vmem:[#allocation2 + $0x10] sm:$0xff]  ;;  %v91_v27 = vld [vmem:[#allocation2 + $0x18] sm:$0xff] }
  0x50   :  { %v92_v28 = vld [vmem:[#allocation2 + $0x20] sm:$0xff]  ;;  %v93_v29 = vld [vmem:[#allocation2 + $0x28] sm:$0xff]  ;;  %v94_v30 = vld [vmem:[#allocation2 + $0x30] sm:$0xff] }
  0x51   :  { %983 = vmatpush3.bf16.msra.mxu0 %v980_v5  ;;  %v95_v31 = vld [vmem:[#allocation2 + $0x38] sm:$0xff]  ;;  %v766_v32 = vld [vmem:[%s1548_s2] ss:$0 sm:$0xff]  ;;  %v364_v50 = vld [vmem:[#allocation7 + $0x8] sm:$0xff] }
  0x52   :  { %985 = vmatprep.subr.bf16.mxu0 %v984_v8  ;;  %v363_v49 = vld [vmem:[#allocation7] sm:$0xff]  ;;  %v365_v51 = vld [vmem:[#allocation7 + $0x10] sm:$0xff]  ;;  %v366_v53 = vld [vmem:[#allocation7 + $0x18] sm:$0xff] }
  0x53   :  { %v1008_v52 = vpack.c.bf16 %v364_v50, %v363_v49  ;;  %v1012_v54 = vpack.c.bf16 %v366_v53, %v365_v51  ;;  %v377_v50 = vld [vmem:[#allocation7 + $0x70] sm:$0xff]  ;;  %v378_v51 = vld [vmem:[#allocation7 + $0x78] sm:$0xff] }
  0x55   :  { %987 = vmatpush3.bf16.msra.mxu0 %v984_v8  ;;  %1009 = vmatprep.subr.bf16.mxu1 %v1008_v52 }
  0x56   :  { %989 = vmatprep.subr.bf16.mxu0 %v988_v12  ;;  %1011 = vmatpush3.bf16.msra.mxu1 %v1008_v52  ;;  %v1036_v52 = vpack.c.bf16 %v378_v51, %v377_v50 }
  0x57   :  { %1013 = vmatprep.subr.bf16.mxu1 %v1012_v54 }
  0x59   :  { %991 = vmatpush3.bf16.msra.mxu0 %v988_v12 }
  0x5a   :  { %993 = vmatprep.subr.bf16.mxu0 %v992_v15  ;;  %1015 = vmatpush3.bf16.msra.mxu1 %v1012_v54 }
  0x5d   :  { %995 = vmatpush3.bf16.msra.mxu0 %v992_v15 }
  0x5e   :  { %997 = vmatprep.subr.bf16.mxu0 %v996_v18 }
  0x61   :  { %999 = vmatpush3.bf16.msra.mxu0 %v996_v18 }
  0x62   :  { %1001 = vmatprep.subr.bf16.mxu0 %v1000_v21 }
  0x65   :  { %1003 = vmatpush3.bf16.msra.mxu0 %v1000_v21 }
  0x66   :  { %1005 = vmatprep.subr.bf16.mxu0 %v1004_v24 }
  0x69   :  { %1007 = vmatpush3.bf16.msra.mxu0 %v1004_v24 }
  0x6c   :  { %877 = vmatmul.mubr.f32.vlgmr.msra.gmra.mrb[0].mxu0 %v89_v25 }
  0x6d   :  { %879 = vmatprep.mubr.f32.mxu0 %v90_v26 }
  0x70   :  { %880 = vmatmul.mubr.f32.gmra.mrb[2].mxu0 %v91_v27 }
  0x71   :  { %882 = vmatprep.mubr.f32.mxu0 %v92_v28 }
  0x74   :  { %883 = vmatmul.mubr.f32.gmra.mrb[4].mxu0 %v93_v29 }
  0x75   :  { %885 = vmatprep.mubr.f32.mxu0 %v94_v30 }
  0x78   :  { %886 = vmatmul.mubr.f32.gmra.mrb[6].mxu0 %v95_v31 }
 0x13f   :  { %v878_v33 = vpop.f32.mrb[0].mxu0 }
 0x140   :  { %v185_v34 = vpop.f32.mrb[1].mxu0  ;;  %v191_v38 = vadd.f32 %v878_v33, %v766_v32 }
 0x141   :  { %v186_v35 = vadd.f32 %v766_v32, %v185_v34 }
 0x143   :  { %v881_v36 = vpop.f32.mrb[2].mxu0  ;;  %229 = vadd.xlane.f32.xlu0 %v186_v35 }
 0x144   :  { %v195_v37 = vpop.f32.mrb[3].mxu0  ;;  %v201_v42 = vadd.f32 %v881_v36, %v766_v32  ;;  %v368_v36 = vld [vmem:[#allocation7 + $0x28] sm:$0xff] }
 0x145   :  { %v196_v39 = vadd.f32 %v766_v32, %v195_v37 }
 0x147   :  { %v884_v40 = vpop.f32.mrb[4].mxu0  ;;  %233 = vadd.xlane.f32.xlu1 %v196_v39  ;;  %231 = vadd.xlane.f32.xlu0 %v191_v38 }
 0x148   :  { %v205_v41 = vpop.f32.mrb[5].mxu0  ;;  %v211_v46 = vadd.f32 %v884_v40, %v766_v32 }
 0x149   :  { %v206_v43 = vadd.f32 %v766_v32, %v205_v41  ;;  %v371_v41 = vld [vmem:[#allocation7 + $0x40] sm:$0xff] }
 0x14b   :  { %v887_v44 = vpop.f32.mrb[6].mxu0  ;;  %235 = vadd.xlane.f32.xlu1 %v201_v42  ;;  %237 = vadd.xlane.f32.xlu0 %v206_v43 }
 0x14c   :  { %v215_v45 = vpop.f32.mrb[7].mxu0  ;;  %v1381_v48 = vadd.f32 %v887_v44, %v766_v32  ;;  %v373_v44 = vld [vmem:[#allocation7 + $0x50] sm:$0xff] }
 0x14d   :  { %v216_v47 = vadd.f32 %v766_v32, %v215_v45  ;;  %v374_v45 = vld [vmem:[#allocation7 + $0x58] sm:$0xff] }
 0x14f   :  { %239 = vadd.xlane.f32.xlu1 %v211_v46  ;;  %241 = vadd.xlane.f32.xlu0 %v216_v47 }
 0x153   :  { %243 = vadd.xlane.f32.xlu1 %v1381_v48 }
 0x1d0   :  { %v230_v57 = vpop.xlane.xlu0 %229 }
 0x1d1   :  { %v245_v58 = vmul.f32 0.03125, %v230_v57 }
 0x1d3   :  { %v253_v61 = vsub.f32 %v186_v35, %v245_v58  ;;  %v367_v35 = vld [vmem:[#allocation7 + $0x20] sm:$0xff] }
 0x1d4   :  { %v234_v62 = vpop.xlane.xlu1 %233  ;;  %v232_v63 = vpop.xlane.xlu0 %231  ;;  %v1016_v37 = vpack.c.bf16 %v368_v36, %v367_v35 }
 0x1d5   :  { %v247_v0 = vmul.f32 0.03125, %v234_v62  ;;  %v246_v1 = vmul.f32 0.03125, %v232_v63  ;;  %v1387_v2 = vmul.f32 %v1384_v60, %v253_v61 }
 0x1d6   :  { %1017 = vmatprep.subr.bf16.mxu1 %v1016_v37 }
 0x1d7   :  { %v255_v3 = vsub.f32 %v196_v39, %v247_v0  ;;  %v254_v4 = vsub.f32 %v191_v38, %v246_v1  ;;  %v269_v5 = vmul.f32 %v1387_v2, %v1387_v2  ;;  %1019 = vmatpush3.bf16.msra.mxu1 %v1016_v37  ;;  %v369_v38 = vld [vmem:[#allocation7 + $0x30] sm:$0xff]  ;;  %v370_v39 = vld [vmem:[#allocation7 + $0x38] sm:$0xff] }
 0x1d8   :  { %v236_v6 = vpop.xlane.xlu1 %235  ;;  %v238_v7 = vpop.xlane.xlu0 %237  ;;  %v1020_v40 = vpack.c.bf16 %v370_v39, %v369_v38 }
 0x1d9   :  { %v248_v8 = vmul.f32 0.03125, %v236_v6  ;;  %v249_v9 = vmul.f32 0.03125, %v238_v7  ;;  %277 = vadd.xlane.f32.xlu0 %v269_v5  ;;  %v1392_v10 = vmul.f32 %v1384_v60, %v255_v3  ;;  %v1395_v11 = vmul.f32 %v1384_v60, %v254_v4 }
 0x1da   :  { %1021 = vmatprep.subr.bf16.mxu1 %v1020_v40 }
 0x1db   :  { %v256_v12 = vsub.f32 %v201_v42, %v248_v8  ;;  %v257_v13 = vsub.f32 %v206_v43, %v249_v9  ;;  %v271_v14 = vmul.f32 %v1392_v10, %v1392_v10  ;;  %v270_v15 = vmul.f32 %v1395_v11, %v1395_v11  ;;  %1023 = vmatpush3.bf16.msra.mxu1 %v1020_v40  ;;  %v372_v42 = vld [vmem:[#allocation7 + $0x48] sm:$0xff] }
 0x1dc   :  { %v240_v16 = vpop.xlane.xlu1 %239  ;;  %v242_v17 = vpop.xlane.xlu0 %241  ;;  %v1024_v43 = vpack.c.bf16 %v372_v42, %v371_v41 }
 0x1dd   :  { %v250_v18 = vmul.f32 0.03125, %v240_v16  ;;  %v251_v19 = vmul.f32 0.03125, %v242_v17  ;;  %281 = vadd.xlane.f32.xlu0 %v271_v14  ;;  %279 = vadd.xlane.f32.xlu1 %v270_v15  ;;  %v1402_v20 = vmul.f32 %v1384_v60, %v256_v12  ;;  %v1405_v21 = vmul.f32 %v1384_v60, %v257_v13  ;;  %v1430_v15 = vld [vmem:[%s1553_s7] ss:$0 sm:$0xff] }
 0x1de   :  { %1025 = vmatprep.subr.bf16.mxu1 %v1024_v43 }
 0x1df   :  { %v258_v22 = vsub.f32 %v211_v46, %v250_v18  ;;  %v259_v23 = vsub.f32 %v216_v47, %v251_v19  ;;  %v272_v24 = vmul.f32 %v1402_v20, %v1402_v20  ;;  %v273_v25 = vmul.f32 %v1405_v21, %v1405_v21  ;;  %1027 = vmatpush3.bf16.msra.mxu1 %v1024_v43  ;;  %v375_v47 = vld [vmem:[#allocation7 + $0x60] sm:$0xff] }
 0x1e0   :  { %v244_v26 = vpop.xlane.xlu1 %243  ;;  %v1028_v46 = vpack.c.bf16 %v374_v45, %v373_v44  ;;  %v1436_v19 = vld [vmem:[%s1554_s8] ss:$0 sm:$0xff] }
 0x1e1   :  { %v252_v27 = vmul.f32 0.03125, %v244_v26  ;;  %283 = vadd.xlane.f32.xlu1 %v272_v24  ;;  %285 = vadd.xlane.f32.xlu0 %v273_v25  ;;  %v1412_v28 = vmul.f32 %v1384_v60, %v258_v22  ;;  %v1415_v29 = vmul.f32 %v1384_v60, %v259_v23 }
 0x1e2   :  { %1029 = vmatprep.subr.bf16.mxu1 %v1028_v46 }
 0x1e3   :  { %v260_v30 = vsub.f32 %v1381_v48, %v252_v27  ;;  %v274_v31 = vmul.f32 %v1412_v28, %v1412_v28  ;;  %v275_v32 = vmul.f32 %v1415_v29, %v1415_v29  ;;  %1031 = vmatpush3.bf16.msra.mxu1 %v1028_v46  ;;  %v376_v48 = vld [vmem:[#allocation7 + $0x68] sm:$0xff] }
 0x1e4   :  { %v1032_v49 = vpack.c.bf16 %v376_v48, %v375_v47 }
 0x1e5   :  { %287 = vadd.xlane.f32.xlu1 %v274_v31  ;;  %289 = vadd.xlane.f32.xlu0 %v275_v32  ;;  %v1423_v33 = vmul.f32 %v1384_v60, %v260_v30 }
 0x1e6   :  { %1033 = vmatprep.subr.bf16.mxu1 %v1032_v49 }
 0x1e7   :  { %v276_v34 = vmul.f32 %v1423_v33, %v1423_v33  ;;  %1035 = vmatpush3.bf16.msra.mxu1 %v1032_v49 }
 0x1e8   :  { %1037 = vmatprep.subr.bf16.mxu1 %v1036_v52 }
 0x1e9   :  { %291 = vadd.xlane.f32.xlu1 %v276_v34 }
 0x1eb   :  { %1039 = vmatpush3.bf16.msra.mxu1 %v1036_v52 }
 0x266   :  { %v278_v53 = vpop.xlane.xlu0 %277 }
 0x267   :  { %v293_v54 = vmul.f32 0.03125, %v278_v53 }
 0x269   :  { %v301_v55 = vadd.f32 1e-05, %v293_v54 }
 0x26a   :  { %v280_v56 = vpop.xlane.xlu1 %279  ;;  %v282_v57 = vpop.xlane.xlu0 %281 }
 0x26b   :  { %1096 = vrsqrt.f32 %v301_v55  ;;  %v294_v58 = vmul.f32 0.03125, %v280_v56  ;;  %v295_v59 = vmul.f32 0.03125, %v282_v57  ;;  %v770_v57 = vld [vmem:[%s1550_s4] ss:$0 sm:$0xff] }
 0x26d   :  { %v302_v61 = vadd.f32 1e-05, %v294_v58  ;;  %v303_v62 = vadd.f32 1e-05, %v295_v59 }
 0x26e   :  { %v284_v63 = vpop.xlane.xlu1 %283  ;;  %v286_v0 = vpop.xlane.xlu0 %285 }
 0x26f   :  { %1098 = vrsqrt.f32 %v302_v61  ;;  %v296_v1 = vmul.f32 0.03125, %v284_v63  ;;  %v297_v3 = vmul.f32 0.03125, %v286_v0 }
 0x270   :  { %1100 = vrsqrt.f32 %v303_v62 }
 0x271   :  { %v304_v4 = vadd.f32 1e-05, %v296_v1  ;;  %v305_v5 = vadd.f32 1e-05, %v297_v3 }
 0x272   :  { %v288_v6 = vpop.xlane.xlu1 %287  ;;  %v290_v7 = vpop.xlane.xlu0 %289 }
 0x273   :  { %1102 = vrsqrt.f32 %v304_v4  ;;  %v298_v8 = vmul.f32 0.03125, %v288_v6  ;;  %v299_v9 = vmul.f32 0.03125, %v290_v7 }
 0x274   :  { %1104 = vrsqrt.f32 %v305_v5 }
 0x275   :  { %v1097_v12 = vpop.eup %1096  ;;  %v306_v13 = vadd.f32 1e-05, %v298_v8  ;;  %v307_v14 = vadd.f32 1e-05, %v299_v9 }
 0x276   :  { %v292_v16 = vpop.xlane.xlu1 %291  ;;  %v317_v17 = vmul.f32 %v1097_v12, %v1387_v2 }
 0x277   :  { %1106 = vrsqrt.f32 %v306_v13  ;;  %v300_v18 = vmul.f32 0.03125, %v292_v16  ;;  %v611_v13 = vld [vmem:[#allocation8] sm:$0xff] }
 0x278   :  { %1108 = vrsqrt.f32 %v307_v14  ;;  %v332_v22 = vmul.f32 %v1430_v15, %v317_v17  ;;  %v612_v14 = vld [vmem:[#allocation8 + $0x8] sm:$0xff] }
 0x279   :  { %v1099_v23 = vpop.eup %1098  ;;  %v308_v24 = vadd.f32 1e-05, %v300_v18  ;;  %v1040_v16 = vpack.c.bf16 %v612_v14, %v611_v13  ;;  %v626_v13 = vld [vmem:[#allocation8 + $0x78] sm:$0xff] }
 0x27a   :  { %v1101_v25 = vpop.eup %1100  ;;  %v347_v26 = vadd.f32 %v1436_v19, %v332_v22  ;;  %v318_v27 = vmul.f32 %v1099_v23, %v1395_v11 }
 0x27b   :  { %1110 = vrsqrt.f32 %v308_v24  ;;  %v319_v2 = vmul.f32 %v1101_v25, %v1392_v10  ;;  %1041 = vmatprep.subr.bf16.mxu0 %v1040_v16  ;;  %1072 = vmatprep.subr.bf16.mxu1 %v1040_v16 }
 0x27c   :  { %v355_v30 = vmax.f32 %v347_v26, 0.0  ;;  %v333_v31 = vmul.f32 %v1430_v15, %v318_v27  ;;  %1043 = vmatpush3.bf16.msra.mxu0 %v1040_v16 }
 0x27d   :  { %v1103_v32 = vpop.eup %1102  ;;  %v334_v34 = vmul.f32 %v1430_v15, %v319_v2 }
 0x27e   :  { %v1105_v35 = vpop.eup %1104  ;;  %920 = vmatprep.mubr.f32.mxu1 %v355_v30  ;;  %v348_v36 = vadd.f32 %v1436_v19, %v333_v31  ;;  %v320_v37 = vmul.f32 %v1103_v32, %v1402_v20 }
 0x27f   :  { %v349_v38 = vadd.f32 %v1436_v19, %v334_v34  ;;  %v321_v39 = vmul.f32 %v1105_v35, %v1405_v21 }
 0x280   :  { %v356_v11 = vmax.f32 %v348_v36, 0.0  ;;  %v335_v40 = vmul.f32 %v1430_v15, %v320_v37 }
 0x281   :  { %v1107_v10 = vpop.eup %1106  ;;  %v357_v41 = vmax.f32 %v349_v38, 0.0  ;;  %v336_v42 = vmul.f32 %v1430_v15, %v321_v39 }
 0x282   :  { %v1109_v43 = vpop.eup %1108  ;;  %921 = vmatmul.mubr.f32.vlgmr.msra.gmra.mrb[0].mxu1 %v356_v11  ;;  %v350_v44 = vadd.f32 %v1436_v19, %v335_v40  ;;  %v322_v45 = vmul.f32 %v1107_v10, %v1412_v28 }
 0x283   :  { %923 = vmatprep.mubr.f32.mxu1 %v357_v41  ;;  %v351_v20 = vadd.f32 %v1436_v19, %v336_v42  ;;  %v323_v46 = vmul.f32 %v1109_v43, %v1415_v29  ;;  %1080 = vmatpush3.bf16.msra.mxu1 %v1040_v16 }
 0x284   :  { %v358_v47 = vmax.f32 %v350_v44, 0.0  ;;  %v337_v21 = vmul.f32 %v1430_v15, %v322_v45 }
 0x285   :  { %v1111_v48 = vpop.eup %1110  ;;  %v359_v49 = vmax.f32 %v351_v20, 0.0  ;;  %v338_v50 = vmul.f32 %v1430_v15, %v323_v46 }
 0x286   :  { %924 = vmatmul.mubr.f32.gmra.mrb[2].mxu1 %v358_v47  ;;  %v352_v51 = vadd.f32 %v1436_v19, %v337_v21  ;;  %v324_v52 = vmul.f32 %v1111_v48, %v1423_v33 }
 0x287   :  { %926 = vmatprep.mubr.f32.mxu1 %v359_v49  ;;  %v353_v28 = vadd.f32 %v1436_v19, %v338_v50 }
 0x288   :  { %v360_v53 = vmax.f32 %v352_v51, 0.0  ;;  %v339_v54 = vmul.f32 %v1430_v15, %v324_v52 }
 0x289   :  { %v361_v55 = vmax.f32 %v353_v28, 0.0 }
 0x28a   :  { %927 = vmatmul.mubr.f32.gmra.mrb[4].mxu1 %v360_v53  ;;  %v354_v29 = vadd.f32 %v1436_v19, %v339_v54  ;;  %v613_v53 = vld [vmem:[#allocation8 + $0x10] sm:$0xff]  ;;  %v614_v54 = vld [vmem:[#allocation8 + $0x18] sm:$0xff] }
 0x28b   :  { %929 = vmatprep.mubr.f32.mxu1 %v361_v55  ;;  %v1044_v55 = vpack.c.bf16 %v614_v54, %v613_v53 }
 0x28c   :  { %v362_v56 = vmax.f32 %v354_v29, 0.0 }
 0x28d   :  { %1045 = vmatprep.subr.bf16.mxu0 %v1044_v55  ;;  %1073 = vmatprep.subr.bf16.mxu1 %v1044_v55 }
 0x28e   :  { %930 = vmatmul.mubr.f32.gmra.mrb[6].mxu1 %v362_v56  ;;  %1047 = vmatpush3.bf16.msra.mxu0 %v1044_v55 }
 0x28f   :  { %1081 = vmatpush3.bf16.msra.mxu1 %v1044_v55 }
 0x355   :  { %v922_v58 = vpop.f32.mrb[0].mxu1 }
 0x356   :  { %v458_v59 = vadd.f32 %v922_v58, %v770_v57  ;;  %v452_v33 = vpop.f32.mrb[1].mxu1  ;;  %v615_v58 = vld [vmem:[#allocation8 + $0x20] sm:$0xff] }
 0x357   :  { %v453_v62 = vadd.f32 %v770_v57, %v452_v33 }
 0x358   :  { %493 = vadd.xlane.f32.xlu0 %v458_v59 }
 0x359   :  { %v925_v61 = vpop.f32.mrb[2].mxu1 }
 0x35a   :  { %v462_v63 = vpop.f32.mrb[3].mxu1  ;;  %v468_v6 = vadd.f32 %v925_v61, %v770_v57 }
 0x35b   :  { %v463_v1 = vadd.f32 %v770_v57, %v462_v63  ;;  %v618_v63 = vld [vmem:[#allocation8 + $0x38] sm:$0xff] }
 0x35c   :  { %491 = vadd.xlane.f32.xlu0 %v453_v62 }
 0x35d   :  { %v928_v0 = vpop.f32.mrb[4].mxu1 }
 0x35e   :  { %v478_v3 = vadd.f32 %v928_v0, %v770_v57  ;;  %v472_v4 = vpop.f32.mrb[5].mxu1 }
 0x35f   :  { %v473_v7 = vadd.f32 %v770_v57, %v472_v4  ;;  %v621_v4 = vld [vmem:[#allocation8 + $0x50] sm:$0xff] }
 0x360   :  { %495 = vadd.xlane.f32.xlu0 %v463_v1  ;;  %501 = vadd.xlane.f32.xlu1 %v478_v3 }
 0x361   :  { %v931_v5 = vpop.f32.mrb[6].mxu1 }
 0x362   :  { %v482_v8 = vpop.f32.mrb[7].mxu1  ;;  %v488_v12 = vadd.f32 %v931_v5, %v770_v57  ;;  %v622_v5 = vld [vmem:[#allocation8 + $0x58] sm:$0xff] }
 0x363   :  { %v483_v9 = vadd.f32 %v770_v57, %v482_v8  ;;  %v624_v8 = vld [vmem:[#allocation8 + $0x68] sm:$0xff] }
 0x364   :  { %497 = vadd.xlane.f32.xlu0 %v468_v6  ;;  %499 = vadd.xlane.f32.xlu1 %v473_v7 }
 0x368   :  { %503 = vadd.xlane.f32.xlu1 %v483_v9 }
 0x36c   :  { %505 = vadd.xlane.f32.xlu1 %v488_v12 }
 0x3e5   :  { %v494_v17 = vpop.xlane.xlu0 %493 }
 0x3e6   :  { %v508_v18 = vmul.f32 0.03125, %v494_v17 }
 0x3e8   :  { %v516_v22 = vsub.f32 %v458_v59, %v508_v18  ;;  %v616_v59 = vld [vmem:[#allocation8 + $0x28] sm:$0xff] }
 0x3e9   :  { %v492_v23 = vpop.xlane.xlu0 %491  ;;  %v1048_v33 = vpack.c.bf16 %v616_v59, %v615_v58 }
 0x3ea   :  { %v507_v24 = vmul.f32 0.03125, %v492_v23  ;;  %v1465_v25 = vmul.f32 %v1384_v60, %v516_v22 }
 0x3eb   :  { %1049 = vmatprep.subr.bf16.mxu0 %v1048_v33  ;;  %1074 = vmatprep.subr.bf16.mxu1 %v1048_v33 }
 0x3ec   :  { %v515_v26 = vsub.f32 %v453_v62, %v507_v24  ;;  %v532_v27 = vmul.f32 %v1465_v25, %v1465_v25  ;;  %1051 = vmatpush3.bf16.msra.mxu0 %v1048_v33  ;;  %v617_v62 = vld [vmem:[#allocation8 + $0x30] sm:$0xff]  ;;  %1082 = vmatpush3.bf16.msra.mxu1 %v1048_v33 }
 0x3ed   :  { %v502_v2 = vpop.xlane.xlu1 %501  ;;  %v496_v30 = vpop.xlane.xlu0 %495  ;;  %v1052_v0 = vpack.c.bf16 %v618_v63, %v617_v62 }
 0x3ee   :  { %v512_v31 = vmul.f32 0.03125, %v502_v2  ;;  %v509_v32 = vmul.f32 0.03125, %v496_v30  ;;  %541 = vadd.xlane.f32.xlu0 %v532_v27  ;;  %v1470_v34 = vmul.f32 %v1384_v60, %v515_v26 }
 0x3ef   :  { %1053 = vmatprep.subr.bf16.mxu0 %v1052_v0  ;;  %1075 = vmatprep.subr.bf16.mxu1 %v1052_v0 }
 0x3f0   :  { %v520_v35 = vsub.f32 %v478_v3, %v512_v31  ;;  %v517_v36 = vsub.f32 %v463_v1, %v509_v32  ;;  %v531_v37 = vmul.f32 %v1470_v34, %v1470_v34  ;;  %1055 = vmatpush3.bf16.msra.mxu0 %v1052_v0  ;;  %v620_v1 = vld [vmem:[#allocation8 + $0x48] sm:$0xff]  ;;  %1083 = vmatpush3.bf16.msra.mxu1 %v1052_v0 }
 0x3f1   :  { %v500_v38 = vpop.xlane.xlu1 %499  ;;  %v498_v39 = vpop.xlane.xlu0 %497 }
 0x3f2   :  { %v511_v11 = vmul.f32 0.03125, %v500_v38  ;;  %v510_v40 = vmul.f32 0.03125, %v498_v39  ;;  %539 = vadd.xlane.f32.xlu0 %v531_v37  ;;  %v1475_v10 = vmul.f32 %v1384_v60, %v520_v35  ;;  %v1478_v41 = vmul.f32 %v1384_v60, %v517_v36 }
 0x3f4   :  { %v519_v42 = vsub.f32 %v473_v7, %v511_v11  ;;  %v518_v43 = vsub.f32 %v468_v6, %v510_v40  ;;  %v536_v44 = vmul.f32 %v1475_v10, %v1475_v10  ;;  %v533_v45 = vmul.f32 %v1478_v41, %v1478_v41  ;;  %v623_v7 = vld [vmem:[#allocation8 + $0x60] sm:$0xff] }
 0x3f5   :  { %v504_v20 = vpop.xlane.xlu1 %503  ;;  %v1060_v6 = vpack.c.bf16 %v622_v5, %v621_v4 }
 0x3f6   :  { %v513_v46 = vmul.f32 0.03125, %v504_v20  ;;  %549 = vadd.xlane.f32.xlu1 %v536_v44  ;;  %543 = vadd.xlane.f32.xlu0 %v533_v45  ;;  %v1485_v47 = vmul.f32 %v1384_v60, %v519_v42  ;;  %v1488_v21 = vmul.f32 %v1384_v60, %v518_v43 }
 0x3f8   :  { %v521_v48 = vsub.f32 %v483_v9, %v513_v46  ;;  %v535_v49 = vmul.f32 %v1485_v47, %v1485_v47  ;;  %v534_v50 = vmul.f32 %v1488_v21, %v1488_v21  ;;  %v1064_v9 = vpack.c.bf16 %v624_v8, %v623_v7 }
 0x3f9   :  { %v506_v51 = vpop.xlane.xlu1 %505 }
 0x3fa   :  { %v514_v52 = vmul.f32 0.03125, %v506_v51  ;;  %547 = vadd.xlane.f32.xlu1 %v535_v49  ;;  %545 = vadd.xlane.f32.xlu0 %v534_v50  ;;  %v1495_v28 = vmul.f32 %v1384_v60, %v521_v48 }
 0x3fc   :  { %v522_v29 = vsub.f32 %v488_v12, %v514_v52  ;;  %v537_v56 = vmul.f32 %v1495_v28, %v1495_v28  ;;  %v625_v12 = vld [vmem:[#allocation8 + $0x70] sm:$0xff] }
 0x3fd   :  { %v1068_v14 = vpack.c.bf16 %v626_v13, %v625_v12 }
 0x3fe   :  { %551 = vadd.xlane.f32.xlu1 %v537_v56  ;;  %v1500_v57 = vmul.f32 %v1384_v60, %v522_v29  ;;  %v619_v60 = vld [vmem:[#allocation8 + $0x40] sm:$0xff] }
 0x3ff   :  { %v1056_v3 = vpack.c.bf16 %v620_v1, %v619_v60 }
 0x400   :  { %v538_v61 = vmul.f32 %v1500_v57, %v1500_v57 }
 0x401   :  { %1057 = vmatprep.subr.bf16.mxu0 %v1056_v3  ;;  %1076 = vmatprep.subr.bf16.mxu1 %v1056_v3 }
 0x402   :  { %553 = vadd.xlane.f32.xlu1 %v538_v61  ;;  %1059 = vmatpush3.bf16.msra.mxu0 %v1056_v3 }
 0x403   :  { %1084 = vmatpush3.bf16.msra.mxu1 %v1056_v3  ;;  %1061 = vmatprep.subr.bf16.mxu0 %v1060_v6 }
 0x404   :  { %1077 = vmatprep.subr.bf16.mxu1 %v1060_v6 }
 0x406   :  { %1063 = vmatpush3.bf16.msra.mxu0 %v1060_v6 }
 0x407   :  { %1085 = vmatpush3.bf16.msra.mxu1 %v1060_v6  ;;  %1065 = vmatprep.subr.bf16.mxu0 %v1064_v9 }
 0x408   :  { %1078 = vmatprep.subr.bf16.mxu1 %v1064_v9 }
 0x40a   :  { %1067 = vmatpush3.bf16.msra.mxu0 %v1064_v9 }
 0x40b   :  { %1086 = vmatpush3.bf16.msra.mxu1 %v1064_v9  ;;  %1069 = vmatprep.subr.bf16.mxu0 %v1068_v14 }
 0x40c   :  { %1079 = vmatprep.subr.bf16.mxu1 %v1068_v14 }
 0x40e   :  { %1071 = vmatpush3.bf16.msra.mxu0 %v1068_v14 }
 0x40f   :  { %1087 = vmatpush3.bf16.msra.mxu1 %v1068_v14 }
 0x47b   :  { %v542_v16 = vpop.xlane.xlu0 %541 }
 0x47c   :  { %v556_v17 = vmul.f32 0.03125, %v542_v16 }
 0x47e   :  { %v564_v18 = vadd.f32 1e-05, %v556_v17 }
 0x47f   :  { %v540_v22 = vpop.xlane.xlu0 %539 }
 0x480   :  { %1112 = vrsqrt.f32 %v564_v18  ;;  %v555_v23 = vmul.f32 0.03125, %v540_v22  ;;  %v771_v22 = vld [vmem:[%s1552_s6] ss:$0 sm:$0xff]  ;;  %s752_s6 = sshll.u32 %s1253_s23, 4  ;;  %s753_s6 = int_to_ptr.vmem [resolvable:$true] %s752_s6 }
 0x481   :  { %s1216_s24 = scalar_lea.vmem %s753_s6, 1024  ;;  %p1221_p5 = scmp.lt.s32.totalorder %s753_s6, %s753_s6 }
 0x482   :  { %v563_v24 = vadd.f32 1e-05, %v555_v23  ;;  %p1217_p4 = scmp.ne.s32.totalorder %s753_s6, %s1216_s24  ;;  %p1222_p6 = scmp.lt.s32.totalorder %s1216_s24, %s1216_s24 }
 0x483   :  { %v550_v26 = vpop.xlane.xlu1 %549  ;;  %v544_v27 = vpop.xlane.xlu0 %543 }
 0x484   :  { %1114 = vrsqrt.f32 %v563_v24  ;;  %v560_v2 = vmul.f32 0.03125, %v550_v26  ;;  %v557_v30 = vmul.f32 0.03125, %v544_v27  ;;  %p1223_p7 = por %p1222_p6, %p1221_p5 }
 0x486   :  { %v568_v31 = vadd.f32 1e-05, %v560_v2  ;;  %v565_v32 = vadd.f32 1e-05, %v557_v30  ;;  %p1224_p8 = pnand %p1223_p7, %p1217_p4 }
 0x487   :  { %v548_v35 = vpop.xlane.xlu1 %547  ;;  %v546_v36 = vpop.xlane.xlu0 %545 }
 0x488   :  { %1116 = vrsqrt.f32 %v568_v31  ;;  %v559_v37 = vmul.f32 0.03125, %v548_v35  ;;  %v558_v38 = vmul.f32 0.03125, %v546_v36 }
 0x489   :  { %1118 = vrsqrt.f32 %v565_v32 }
 0x48a   :  { %v1113_v39 = vpop.eup %1112  ;;  %v567_v11 = vadd.f32 1e-05, %v559_v37  ;;  %v566_v40 = vadd.f32 1e-05, %v558_v38 }
 0x48b   :  { %v580_v42 = vmul.f32 %v1113_v39, %v1465_v25  ;;  %v552_v43 = vpop.xlane.xlu1 %551 }
 0x48c   :  { %1120 = vrsqrt.f32 %v567_v11  ;;  %v561_v44 = vmul.f32 0.03125, %v552_v43 }
 0x48d   :  { %1122 = vrsqrt.f32 %v566_v40  ;;  %v588_v46 = vmul.f32 %v1430_v15, %v580_v42 }
 0x48e   :  { %v1115_v45 = vpop.eup %1114  ;;  %v569_v20 = vadd.f32 1e-05, %v561_v44 }
 0x48f   :  { %v554_v48 = vpop.xlane.xlu1 %553  ;;  %v579_v49 = vmul.f32 %v1115_v45, %v1470_v34  ;;  %v596_v54 = vadd.f32 %v1436_v19, %v588_v46 }
 0x490   :  { %1124 = vrsqrt.f32 %v569_v20  ;;  %v562_v50 = vmul.f32 0.03125, %v554_v48 }
 0x491   :  { %v587_v51 = vmul.f32 %v1430_v15, %v579_v49  ;;  %v604_v33 = vmax.f32 %v596_v54, 0.0 }
 0x492   :  { %v1117_v52 = vpop.eup %1116  ;;  %v570_v53 = vadd.f32 1e-05, %v562_v50 }
 0x493   :  { %v1119_v25 = vpop.eup %1118  ;;  %v584_v55 = vmul.f32 %v1117_v52, %v1475_v10  ;;  %v595_v29 = vadd.f32 %v1436_v19, %v587_v51 }
 0x494   :  { %1126 = vrsqrt.f32 %v570_v53  ;;  %v581_v56 = vmul.f32 %v1119_v25, %v1478_v41 }
 0x495   :  { %v603_v58 = vmax.f32 %v595_v29, 0.0  ;;  %v592_v61 = vmul.f32 %v1430_v15, %v584_v55 }
 0x496   :  { %v1121_v59 = vpop.eup %1120  ;;  %v589_v34 = vmul.f32 %v1430_v15, %v581_v56 }
 0x497   :  { %v1123_v62 = vpop.eup %1122  ;;  %964 = vmatprep.mubr.f32.mxu0 %v603_v58  ;;  %v583_v63 = vmul.f32 %v1121_v59, %v1485_v47  ;;  %v600_v4 = vadd.f32 %v1436_v19, %v592_v61 }
 0x498   :  { %965 = vmatmul.mubr.f32.vlgmr.msra.gmra.mrb[8].mxu0 %v604_v33  ;;  %v597_v0 = vadd.f32 %v1436_v19, %v589_v34  ;;  %v582_v10 = vmul.f32 %v1123_v62, %v1488_v21 }
 0x499   :  { %v591_v60 = vmul.f32 %v1430_v15, %v583_v63  ;;  %v608_v12 = vmax.f32 %v600_v4, 0.0 }
 0x49a   :  { %v1125_v1 = vpop.eup %1124  ;;  %v605_v41 = vmax.f32 %v597_v0, 0.0  ;;  %v590_v3 = vmul.f32 %v1430_v15, %v582_v10 }
 0x49b   :  { %v599_v5 = vadd.f32 %v1436_v19, %v591_v60  ;;  %v585_v6 = vmul.f32 %v1125_v1, %v1495_v28 }
 0x49c   :  { %967 = vmatprep.mubr.f32.mxu0 %v605_v41  ;;  %v598_v47 = vadd.f32 %v1436_v19, %v590_v3 }
 0x49d   :  { %v607_v7 = vmax.f32 %v599_v5, 0.0  ;;  %v593_v8 = vmul.f32 %v1430_v15, %v585_v6 }
 0x49e   :  { %v1127_v9 = vpop.eup %1126  ;;  %v606_v21 = vmax.f32 %v598_v47, 0.0 }
 0x49f   :  { %970 = vmatprep.mubr.f32.mxu1 %v607_v7  ;;  %v601_v13 = vadd.f32 %v1436_v19, %v593_v8  ;;  %v586_v14 = vmul.f32 %v1127_v9, %v1500_v57 }
 0x4a0   :  { %968 = vmatmul.mubr.f32.gmra.mrb[10].mxu0 %v606_v21  ;;  %971 = vmatmul.mubr.f32.vlgmr.msra.gmra.mrb[8].mxu1 %v608_v12 }
 0x4a1   :  { %v609_v16 = vmax.f32 %v601_v13, 0.0  ;;  %v594_v17 = vmul.f32 %v1430_v15, %v586_v14 }
 0x4a3   :  { %973 = vmatprep.mubr.f32.mxu1 %v609_v16  ;;  %v602_v28 = vadd.f32 %v1436_v19, %v594_v17 }
 0x4a5   :  { %v610_v18 = vmax.f32 %v602_v28, 0.0 }
 0x4a7   :  { %974 = vmatmul.mubr.f32.gmra.mrb[10].mxu1 %v610_v18 }
 0x56b   :  { %v966_v23 = vpop.f32.mrb[8].mxu0 }
 0x56c   :  { %v706_v24 = vadd.f32 %v966_v23, %v771_v22  ;;  %v700_v26 = vpop.f32.mrb[9].mxu0 }
 0x56d   :  { %v701_v27 = vadd.f32 %v771_v22, %v700_v26 }
 0x56e   :  { %740 = vst [vmem:[#allocation10 + $0x8] sm:$0xff] %v706_v24 }
 0x56f   :  { %739 = vst [vmem:[#allocation10] sm:$0xff] %v701_v27 }
 0x573   :  { %v969_v57 = vpop.f32.mrb[10].mxu0  ;;  %v972_v2 = vpop.f32.mrb[8].mxu1 }
 0x574   :  { %v716_v30 = vadd.f32 %v969_v57, %v771_v22  ;;  %v710_v31 = vpop.f32.mrb[11].mxu0  ;;  %v726_v15 = vadd.f32 %v972_v2, %v771_v22  ;;  %v720_v32 = vpop.f32.mrb[9].mxu1 }
 0x575   :  { %v711_v35 = vadd.f32 %v771_v22, %v710_v31  ;;  %v721_v19 = vadd.f32 %v771_v22, %v720_v32 }
 0x576   :  { %742 = vst [vmem:[#allocation10 + $0x18] sm:$0xff] %v716_v30  ;;  %744 = vst [vmem:[#allocation10 + $0x28] sm:$0xff] %v726_v15 }
 0x577   :  { %741 = vst [vmem:[#allocation10 + $0x10] sm:$0xff] %v711_v35  ;;  %743 = vst [vmem:[#allocation10 + $0x20] sm:$0xff] %v721_v19 }
 0x57a   :  { %v975_v36 = vpop.f32.mrb[10].mxu1 }
 0x57b   :  { %v736_v37 = vadd.f32 %v975_v36, %v771_v22  ;;  %v730_v38 = vpop.f32.mrb[11].mxu1 }
 0x57c   :  { %v731_v39 = vadd.f32 %v771_v22, %v730_v38 }
 0x57d   :  { %746 = vst [vmem:[#allocation10 + $0x38] sm:$0xff] %v736_v37 }
 0x57e   :  { %745 = vst [vmem:[#allocation10 + $0x30] sm:$0xff] %v731_v39 }
 0x57f   :  { %1227 = shalt.err (!%p1224_p8)
}
 0x580   :  { %s1228_s0 = scalar_lea.hbm %s1555_s9, 1024 }
 0x581   :  { %p1229_p9 = scmp.ne.s32.totalorder %s1555_s9, %s1228_s0  ;;  %p1232_p10 = scmp.lt.u32.totalorder %s1228_s0, %s1555_s9 }
 0x583   :  { %p1234_p11 = pnand %p1232_p10, %p1229_p9 }
 0x585   :  { %1237 = shalt.err (!%p1234_p11)
}
 0x586   :  { %758 = dma.vmem_to_hbm [thread:$0]  %s753_s6, 1024, %s1555_s9, [#allocation4], %s1248_s21, %s1248_s21, %s1249_s22  }
 0x587   :  { %1244 = dma.done.wait [#allocation4], 1024  }
 0x588   :  { %1245 = vsyncadd [#allocation4], 4294966272 }
 0x589   :  { %762 = vsyncpa [#allocation3], 1 }
 0x58a   :  { %763 = vsyncpa [#allocation6], 1 }
 0x58b   :  { %764 = vsyncpa [#allocation9], 1 }
 0x58c   :  { %765 = vsyncpa [#allocation4], 1 }

</bundles_post_ra>
